<compile_context>
chip_gen: v5e
topology: v5e:2x2
jax: 0.10.0
libtpu: 0.0.40
codegen_flags: <defaults>
</compile_context>

<pallas_src>
import math

import jax
import jax.numpy as jnp
from jax.experimental import pallas as pl
from jax.experimental.pallas import tpu as pltpu

# ---- small, self-consistent model dims (scaled down from 768 / 12 / 64) ----
# d_model kept at 128 so the lane dimension is fully dense (128 lanes / vreg).
D_MODEL = 128
N_HEADS = 4
D_K = D_V = 32
BATCH = 2
SEQ = 8


# --------------------------------------------------------------------------
# Single fused kernel: one batch element per grid step (grid=(B,), parallel).
# --------------------------------------------------------------------------
def _fused_mha_kernel(x_ref, mask_ref, wqkv_ref, bqkv_ref, wo_ref, bo_ref,
                      gamma_ref, beta_ref, o_ref):
    x = x_ref[0]                    # [S, D_MODEL] f32  (also the residual)
    mask = mask_ref[0]              # [S, S] int32 (nonzero = masked)

    # ---- fused Q|K|V projection: one MXU matmul, f32 accumulation ----------
    qkv = (
        jnp.dot(x.astype(jnp.bfloat16), wqkv_ref[...],
                preferred_element_type=jnp.float32)
        + bqkv_ref[...]
    )                               # [S, 3*H*D_K] f32

    hdk = N_HEADS * D_K
    scale = jnp.float32(1.0 / math.sqrt(D_K))
    # fold 1/sqrt(d_k) into q (cheaper than scaling the [S,S] score matrices)
    q = (qkv[:, 0 * hdk:1 * hdk] * scale).astype(jnp.bfloat16)   # [S, H*D_K]
    k = qkv[:, 1 * hdk:2 * hdk].astype(jnp.bfloat16)             # [S, H*D_K]
    v = qkv[:, 2 * hdk:3 * hdk].astype(jnp.bfloat16)             # [S, H*D_V]

    neg_inf = jnp.float32(-1e9)
    masked = mask != 0

    # ---- per-head attention, statically unrolled (H small); all in VMEM ----
    ctx_parts = []
    for h in range(N_HEADS):
        lo = h * D_K
        q_h = q[:, lo:lo + D_K]     # [S, D_K] bf16
        k_h = k[:, lo:lo + D_K]
        v_h = v[:, lo:lo + D_V]

        # q_h @ k_h^T without materializing a transpose: contract last dims.
        s_h = jax.lax.dot_general(
            q_h, k_h, (((1,), (1,)), ((), ())),
            preferred_element_type=jnp.float32)                  # [S, S] f32
        s_h = jnp.where(masked, neg_inf, s_h)

        # numerically stable softmax (f32 stats); reciprocal on the EUP slot.
        m_h = jnp.max(s_h, axis=-1, keepdims=True)
        e_h = jnp.exp(s_h - m_h)
        denom = jnp.sum(e_h, axis=-1, keepdims=True)
        attn_h = e_h * pl.reciprocal(denom, approx=True)         # [S, S] f32

        ctx_parts.append(
            jnp.dot(attn_h.astype(jnp.bfloat16), v_h,
                    preferred_element_type=jnp.float32))         # [S, D_V] f32

    context = jnp.concatenate(ctx_parts, axis=-1)                # [S, H*D_V] f32

    # ---- output projection + residual + LayerNorm (f32 statistics) ---------
    out = (
        jnp.dot(context.astype(jnp.bfloat16), wo_ref[...],
                preferred_element_type=jnp.float32)
        + bo_ref[...]
        + x
    )                                                            # [S, D_MODEL]

    mean = jnp.mean(out, axis=-1, keepdims=True)
    cent = out - mean
    var = jnp.mean(cent * cent, axis=-1, keepdims=True)          # biased, like torch
    inv = jax.lax.rsqrt(var + jnp.float32(1e-5))
    o_ref[0] = (cent * inv * gamma_ref[...] + beta_ref[...]).astype(o_ref.dtype)


def bert_self_attention(params, x, attn_mask):
    """Fused MHA forward for BERT self-attention (Q = K = V = x).

    x:         [B, S, D_MODEL] float32
    attn_mask: [B, S, S] int32 (nonzero = masked key position)
    returns    [B, S, D_MODEL] float32
    """
    # TODO(synk): distinct Q/K/V inputs (cross-attention) would need per-input
    # projection matmuls; the BERT forward pass only uses self-attention.
    B, S, D = x.shape
    hdk = N_HEADS * D_K

    # Fused projection weight/bias: [D, 3*H*D_K] / [1, 3*H*D_K].
    w_qkv = jnp.concatenate([params["wq"], params["wk"], params["wv"]], axis=1)
    b_qkv = jnp.concatenate([params["bq"], params["bk"], params["bv"]], axis=1)

    return pl.pallas_call(
        _fused_mha_kernel,
        out_shape=jax.ShapeDtypeStruct((B, S, D), jnp.float32),
        grid=(B,),
        in_specs=[
            pl.BlockSpec((1, S, D), lambda b: (b, 0, 0)),                 # x
            pl.BlockSpec((1, S, S), lambda b: (b, 0, 0)),                 # mask
            pl.BlockSpec((D, 3 * hdk), lambda b: (0, 0)),                 # W_qkv (bf16)
            pl.BlockSpec((1, 3 * hdk), lambda b: (0, 0)),                 # b_qkv
            pl.BlockSpec((N_HEADS * D_V, D), lambda b: (0, 0)),           # W_o (bf16)
            pl.BlockSpec((1, D), lambda b: (0, 0)),                       # b_o
            pl.BlockSpec((1, D), lambda b: (0, 0)),                       # gamma
            pl.BlockSpec((1, D), lambda b: (0, 0)),                       # beta
        ],
        out_specs=pl.BlockSpec((1, S, D), lambda b: (b, 0, 0)),
        compiler_params=pltpu.CompilerParams(
            dimension_semantics=("parallel",)),
    )(x, attn_mask, w_qkv, b_qkv, params["wo"], params["bo"],
      params["gamma"], params["beta"])


# --------------------------------------------------------------------------
# Parameters (weights stored [in, out] = PyTorch W.T so y = x @ W + b).
# Matmul weights kept in bf16 (MXU inputs); biases / LN params in f32.
# --------------------------------------------------------------------------
def init_params(key):
    ks = jax.random.split(key, 8)
    scale = 0.02
    w = lambda k, shp: (scale * jax.random.normal(k, shp, jnp.float32)).astype(jnp.bfloat16)
    b = lambda k, shp: scale * jax.random.normal(k, shp, jnp.float32)
    return {
        "wq": w(ks[0], (D_MODEL, N_HEADS * D_K)),
        "bq": b(ks[1], (1, N_HEADS * D_K)),
        "wk": w(ks[2], (D_MODEL, N_HEADS * D_K)),
        "bk": b(ks[3], (1, N_HEADS * D_K)),
        "wv": w(ks[4], (D_MODEL, N_HEADS * D_V)),
        "bv": b(ks[5], (1, N_HEADS * D_V)),
        "wo": w(ks[6], (N_HEADS * D_V, D_MODEL)),
        "bo": b(ks[7], (1, D_MODEL)),
        "gamma": jnp.ones((1, D_MODEL), jnp.float32),
        "beta": jnp.zeros((1, D_MODEL), jnp.float32),
    }


# --------------------------------------------------------------------------
# Pure-JAX reference (f32, highest precision) matching the PyTorch module.
# --------------------------------------------------------------------------
def mha_reference(params, x, attn_mask):
    B, S, D = x.shape
    hp = jax.lax.Precision.HIGHEST
    f32 = lambda a: a.astype(jnp.float32)

    q = jnp.dot(x, f32(params["wq"]), precision=hp) + params["bq"]
    k = jnp.dot(x, f32(params["wk"]), precision=hp) + params["bk"]
    v = jnp.dot(x, f32(params["wv"]), precision=hp) + params["bv"]
    q = q.reshape(B, S, N_HEADS, D_K).transpose(0, 2, 1, 3)
    k = k.reshape(B, S, N_HEADS, D_K).transpose(0, 2, 1, 3)
    v = v.reshape(B, S, N_HEADS, D_V).transpose(0, 2, 1, 3)

    scores = jnp.einsum("bhqd,bhkd->bhqk", q, k, precision=hp) / math.sqrt(D_K)
    scores = jnp.where(attn_mask[:, None, :, :] != 0, jnp.float32(-1e9), scores)
    attn = jax.nn.softmax(scores, axis=-1)
    ctx = jnp.einsum("bhqk,bhkd->bhqd", attn, v, precision=hp)
    ctx = ctx.transpose(0, 2, 1, 3).reshape(B, S, N_HEADS * D_V)

    out = jnp.dot(ctx, f32(params["wo"]), precision=hp) + params["bo"] + x
    mean = jnp.mean(out, axis=-1, keepdims=True)
    cent = out - mean
    var = jnp.mean(cent * cent, axis=-1, keepdims=True)
    return cent * jax.lax.rsqrt(var + 1e-5) * params["gamma"] + params["beta"]


if __name__ == "__main__":
    key = jax.random.PRNGKey(0)
    kp, kx = jax.random.split(key)

    params = init_params(kp)
    x = jax.random.normal(kx, (BATCH, SEQ, D_MODEL), jnp.float32)

    # BERT-style padding mask: last 2 key positions are [PAD] (nonzero = masked)
    attn_mask = jnp.zeros((BATCH, SEQ, SEQ), jnp.int32)
    attn_mask = attn_mask.at[:, :, SEQ - 2:].set(1)

    mha = jax.jit(bert_self_attention)
    out = mha(params, x, attn_mask)
    jax.block_until_ready(out)

    assert out.shape == (BATCH, SEQ, D_MODEL)
    assert bool(jnp.all(jnp.isfinite(out)))
    ref = mha_reference(params, x, attn_mask)
    max_err = float(jnp.max(jnp.abs(out - ref)))
    assert max_err < 2e-2, f"max abs error vs reference: {max_err}"

    print("KERNEL_OK")
</pallas_src>

<mosaic_0001>
module attributes {stable_mosaic.version = 11 : i64} {
  func.func @_fused_mha_kernel(%arg0: i32, %arg1: memref<1x8x128xf32, #tpu.memory_space<vmem>>, %arg2: memref<1x8x8xi32, #tpu.memory_space<vmem>>, %arg3: memref<128x384xbf16, #tpu.memory_space<vmem>>, %arg4: memref<1x384xf32, #tpu.memory_space<vmem>>, %arg5: memref<128x128xbf16, #tpu.memory_space<vmem>>, %arg6: memref<1x128xf32, #tpu.memory_space<vmem>>, %arg7: memref<1x128xf32, #tpu.memory_space<vmem>>, %arg8: memref<1x128xf32, #tpu.memory_space<vmem>>, %arg9: memref<1x8x128xf32, #tpu.memory_space<vmem>>) attributes {dimension_semantics = [#tpu.dimension_semantics<parallel>], iteration_bounds = array<i64: 2>, scalar_prefetch = 0 : i64, scratch_operands = 0 : i64, tpu.core_type = #tpu.core_type<tc>, window_params = [{transform_indices = @transform_0, window_bounds = array<i64: 1, 8, 128>}, {transform_indices = @transform_1, window_bounds = array<i64: 1, 8, 8>}, {pipeline_mode = #tpu.pipeline_mode<synchronous>, transform_indices = @transform_2, window_bounds = array<i64: 128, 384>}, {pipeline_mode = #tpu.pipeline_mode<synchronous>, transform_indices = @transform_3, window_bounds = array<i64: 1, 384>}, {pipeline_mode = #tpu.pipeline_mode<synchronous>, transform_indices = @transform_4, window_bounds = array<i64: 128, 128>}, {pipeline_mode = #tpu.pipeline_mode<synchronous>, transform_indices = @transform_5, window_bounds = array<i64: 1, 128>}, {pipeline_mode = #tpu.pipeline_mode<synchronous>, transform_indices = @transform_6, window_bounds = array<i64: 1, 128>}, {pipeline_mode = #tpu.pipeline_mode<synchronous>, transform_indices = @transform_7, window_bounds = array<i64: 1, 128>}, {transform_indices = @transform_8, window_bounds = array<i64: 1, 8, 128>}]} {
    %c0 = arith.constant 0 : index
    %c0_0 = arith.constant 0 : index
    %c0_1 = arith.constant 0 : index
    %0 = vector.load %arg1[%c0, %c0_0, %c0_1] : memref<1x8x128xf32, #tpu.memory_space<vmem>>, vector<1x8x128xf32>
    %1 = vector.shape_cast %0 : vector<1x8x128xf32> to vector<8x128xf32>
    %c0_2 = arith.constant 0 : index
    %c0_3 = arith.constant 0 : index
    %c0_4 = arith.constant 0 : index
    %2 = vector.load %arg2[%c0_2, %c0_3, %c0_4] : memref<1x8x8xi32, #tpu.memory_space<vmem>>, vector<1x8x8xi32>
    %3 = vector.shape_cast %2 : vector<1x8x8xi32> to vector<8x8xi32>
    %4 = arith.truncf %1 : vector<8x128xf32> to vector<8x128xbf16>
    %c0_5 = arith.constant 0 : index
    %c0_6 = arith.constant 0 : index
    %5 = vector.load %arg3[%c0_5, %c0_6] : memref<128x384xbf16, #tpu.memory_space<vmem>>, vector<128x384xbf16>
    %cst = arith.constant dense<0.000000e+00> : vector<8x384xf32>
    %6 = tpu.matmul %4, %5, %cst {dimension_numbers = #tpu.dot_dimension_numbers<[1], [0], [0], [1], [0, 0, 1, 1], [], []>} : vector<8x128xbf16>, vector<128x384xbf16>, vector<8x384xf32> -> vector<8x384xf32>
    %c0_7 = arith.constant 0 : index
    %c0_8 = arith.constant 0 : index
    %7 = vector.load %arg4[%c0_7, %c0_8] : memref<1x384xf32, #tpu.memory_space<vmem>>, vector<1x384xf32>
    %8 = vector.broadcast %7 : vector<1x384xf32> to vector<8x384xf32>
    %9 = arith.addf %6, %8 : vector<8x384xf32>
    %10 = vector.extract_strided_slice %9 {offsets = [0, 0], sizes = [8, 128], strides = [1, 1]} : vector<8x384xf32> to vector<8x128xf32>
    %cst_9 = arith.constant 0.176776692 : f32
    %11 = vector.broadcast %cst_9 : f32 to vector<8x128xf32>
    %12 = arith.mulf %10, %11 : vector<8x128xf32>
    %13 = arith.truncf %12 : vector<8x128xf32> to vector<8x128xbf16>
    %14 = vector.extract_strided_slice %9 {offsets = [0, 128], sizes = [8, 128], strides = [1, 1]} : vector<8x384xf32> to vector<8x128xf32>
    %15 = arith.truncf %14 : vector<8x128xf32> to vector<8x128xbf16>
    %16 = vector.extract_strided_slice %9 {offsets = [0, 256], sizes = [8, 128], strides = [1, 1]} : vector<8x384xf32> to vector<8x128xf32>
    %17 = arith.truncf %16 : vector<8x128xf32> to vector<8x128xbf16>
    %c0_i32 = arith.constant 0 : i32
    %18 = vector.broadcast %c0_i32 : i32 to vector<8x8xi32>
    %19 = arith.cmpi ne, %3, %18 : vector<8x8xi32>
    %20 = vector.extract_strided_slice %13 {offsets = [0, 0], sizes = [8, 32], strides = [1, 1]} : vector<8x128xbf16> to vector<8x32xbf16>
    %21 = vector.extract_strided_slice %15 {offsets = [0, 0], sizes = [8, 32], strides = [1, 1]} : vector<8x128xbf16> to vector<8x32xbf16>
    %22 = vector.extract_strided_slice %17 {offsets = [0, 0], sizes = [8, 32], strides = [1, 1]} : vector<8x128xbf16> to vector<8x32xbf16>
    %cst_10 = arith.constant dense<0.000000e+00> : vector<8x8xf32>
    %23 = tpu.matmul %20, %21, %cst_10 {dimension_numbers = #tpu.dot_dimension_numbers<[1], [1], [0], [0], [0, 0, 1, 0], [], []>} : vector<8x32xbf16>, vector<8x32xbf16>, vector<8x8xf32> -> vector<8x8xf32>
    %cst_11 = arith.constant -1.000000e+09 : f32
    %24 = vector.broadcast %cst_11 : f32 to vector<8x8xf32>
    %25 = arith.select %19, %24, %23 : vector<8x8xi1>, vector<8x8xf32>
    %cst_12 = arith.constant dense<0xFF800000> : vector<8xf32>
    %26 = vector.multi_reduction <maximumf>, %25, %cst_12 [1] : vector<8x8xf32> to vector<8xf32>
    %27 = vector.shape_cast %26 : vector<8xf32> to vector<8x1xf32>
    %28 = vector.broadcast %27 : vector<8x1xf32> to vector<8x8xf32>
    %29 = arith.subf %25, %28 : vector<8x8xf32>
    %30 = math.exp %29 : vector<8x8xf32>
    %cst_13 = arith.constant dense<0.000000e+00> : vector<8xf32>
    %31 = vector.multi_reduction <add>, %30, %cst_13 [1] : vector<8x8xf32> to vector<8xf32>
    %32 = vector.shape_cast %31 : vector<8xf32> to vector<8x1xf32>
    %33 = tpu.reciprocal %32 {approx = true} : vector<8x1xf32> -> vector<8x1xf32>
    %34 = vector.broadcast %33 : vector<8x1xf32> to vector<8x8xf32>
    %35 = arith.mulf %30, %34 : vector<8x8xf32>
    %36 = arith.truncf %35 : vector<8x8xf32> to vector<8x8xbf16>
    %cst_14 = arith.constant dense<0.000000e+00> : vector<8x32xf32>
    %37 = tpu.matmul %36, %22, %cst_14 {dimension_numbers = #tpu.dot_dimension_numbers<[1], [0], [0], [1], [0, 0, 1, 1], [], []>} : vector<8x8xbf16>, vector<8x32xbf16>, vector<8x32xf32> -> vector<8x32xf32>
    %38 = vector.extract_strided_slice %13 {offsets = [0, 32], sizes = [8, 32], strides = [1, 1]} : vector<8x128xbf16> to vector<8x32xbf16>
    %39 = vector.extract_strided_slice %15 {offsets = [0, 32], sizes = [8, 32], strides = [1, 1]} : vector<8x128xbf16> to vector<8x32xbf16>
    %40 = vector.extract_strided_slice %17 {offsets = [0, 32], sizes = [8, 32], strides = [1, 1]} : vector<8x128xbf16> to vector<8x32xbf16>
    %cst_15 = arith.constant dense<0.000000e+00> : vector<8x8xf32>
    %41 = tpu.matmul %38, %39, %cst_15 {dimension_numbers = #tpu.dot_dimension_numbers<[1], [1], [0], [0], [0, 0, 1, 0], [], []>} : vector<8x32xbf16>, vector<8x32xbf16>, vector<8x8xf32> -> vector<8x8xf32>
    %cst_16 = arith.constant -1.000000e+09 : f32
    %42 = vector.broadcast %cst_16 : f32 to vector<8x8xf32>
    %43 = arith.select %19, %42, %41 : vector<8x8xi1>, vector<8x8xf32>
    %cst_17 = arith.constant dense<0xFF800000> : vector<8xf32>
    %44 = vector.multi_reduction <maximumf>, %43, %cst_17 [1] : vector<8x8xf32> to vector<8xf32>
    %45 = vector.shape_cast %44 : vector<8xf32> to vector<8x1xf32>
    %46 = vector.broadcast %45 : vector<8x1xf32> to vector<8x8xf32>
    %47 = arith.subf %43, %46 : vector<8x8xf32>
    %48 = math.exp %47 : vector<8x8xf32>
    %cst_18 = arith.constant dense<0.000000e+00> : vector<8xf32>
    %49 = vector.multi_reduction <add>, %48, %cst_18 [1] : vector<8x8xf32> to vector<8xf32>
    %50 = vector.shape_cast %49 : vector<8xf32> to vector<8x1xf32>
    %51 = tpu.reciprocal %50 {approx = true} : vector<8x1xf32> -> vector<8x1xf32>
    %52 = vector.broadcast %51 : vector<8x1xf32> to vector<8x8xf32>
    %53 = arith.mulf %48, %52 : vector<8x8xf32>
    %54 = arith.truncf %53 : vector<8x8xf32> to vector<8x8xbf16>
    %cst_19 = arith.constant dense<0.000000e+00> : vector<8x32xf32>
    %55 = tpu.matmul %54, %40, %cst_19 {dimension_numbers = #tpu.dot_dimension_numbers<[1], [0], [0], [1], [0, 0, 1, 1], [], []>} : vector<8x8xbf16>, vector<8x32xbf16>, vector<8x32xf32> -> vector<8x32xf32>
    %56 = vector.extract_strided_slice %13 {offsets = [0, 64], sizes = [8, 32], strides = [1, 1]} : vector<8x128xbf16> to vector<8x32xbf16>
    %57 = vector.extract_strided_slice %15 {offsets = [0, 64], sizes = [8, 32], strides = [1, 1]} : vector<8x128xbf16> to vector<8x32xbf16>
    %58 = vector.extract_strided_slice %17 {offsets = [0, 64], sizes = [8, 32], strides = [1, 1]} : vector<8x128xbf16> to vector<8x32xbf16>
    %cst_20 = arith.constant dense<0.000000e+00> : vector<8x8xf32>
    %59 = tpu.matmul %56, %57, %cst_20 {dimension_numbers = #tpu.dot_dimension_numbers<[1], [1], [0], [0], [0, 0, 1, 0], [], []>} : vector<8x32xbf16>, vector<8x32xbf16>, vector<8x8xf32> -> vector<8x8xf32>
    %cst_21 = arith.constant -1.000000e+09 : f32
    %60 = vector.broadcast %cst_21 : f32 to vector<8x8xf32>
    %61 = arith.select %19, %60, %59 : vector<8x8xi1>, vector<8x8xf32>
    %cst_22 = arith.constant dense<0xFF800000> : vector<8xf32>
    %62 = vector.multi_reduction <maximumf>, %61, %cst_22 [1] : vector<8x8xf32> to vector<8xf32>
    %63 = vector.shape_cast %62 : vector<8xf32> to vector<8x1xf32>
    %64 = vector.broadcast %63 : vector<8x1xf32> to vector<8x8xf32>
    %65 = arith.subf %61, %64 : vector<8x8xf32>
    %66 = math.exp %65 : vector<8x8xf32>
    %cst_23 = arith.constant dense<0.000000e+00> : vector<8xf32>
    %67 = vector.multi_reduction <add>, %66, %cst_23 [1] : vector<8x8xf32> to vector<8xf32>
    %68 = vector.shape_cast %67 : vector<8xf32> to vector<8x1xf32>
    %69 = tpu.reciprocal %68 {approx = true} : vector<8x1xf32> -> vector<8x1xf32>
    %70 = vector.broadcast %69 : vector<8x1xf32> to vector<8x8xf32>
    %71 = arith.mulf %66, %70 : vector<8x8xf32>
    %72 = arith.truncf %71 : vector<8x8xf32> to vector<8x8xbf16>
    %cst_24 = arith.constant dense<0.000000e+00> : vector<8x32xf32>
    %73 = tpu.matmul %72, %58, %cst_24 {dimension_numbers = #tpu.dot_dimension_numbers<[1], [0], [0], [1], [0, 0, 1, 1], [], []>} : vector<8x8xbf16>, vector<8x32xbf16>, vector<8x32xf32> -> vector<8x32xf32>
    %74 = vector.extract_strided_slice %13 {offsets = [0, 96], sizes = [8, 32], strides = [1, 1]} : vector<8x128xbf16> to vector<8x32xbf16>
    %75 = vector.extract_strided_slice %15 {offsets = [0, 96], sizes = [8, 32], strides = [1, 1]} : vector<8x128xbf16> to vector<8x32xbf16>
    %76 = vector.extract_strided_slice %17 {offsets = [0, 96], sizes = [8, 32], strides = [1, 1]} : vector<8x128xbf16> to vector<8x32xbf16>
    %cst_25 = arith.constant dense<0.000000e+00> : vector<8x8xf32>
    %77 = tpu.matmul %74, %75, %cst_25 {dimension_numbers = #tpu.dot_dimension_numbers<[1], [1], [0], [0], [0, 0, 1, 0], [], []>} : vector<8x32xbf16>, vector<8x32xbf16>, vector<8x8xf32> -> vector<8x8xf32>
    %cst_26 = arith.constant -1.000000e+09 : f32
    %78 = vector.broadcast %cst_26 : f32 to vector<8x8xf32>
    %79 = arith.select %19, %78, %77 : vector<8x8xi1>, vector<8x8xf32>
    %cst_27 = arith.constant dense<0xFF800000> : vector<8xf32>
    %80 = vector.multi_reduction <maximumf>, %79, %cst_27 [1] : vector<8x8xf32> to vector<8xf32>
    %81 = vector.shape_cast %80 : vector<8xf32> to vector<8x1xf32>
    %82 = vector.broadcast %81 : vector<8x1xf32> to vector<8x8xf32>
    %83 = arith.subf %79, %82 : vector<8x8xf32>
    %84 = math.exp %83 : vector<8x8xf32>
    %cst_28 = arith.constant dense<0.000000e+00> : vector<8xf32>
    %85 = vector.multi_reduction <add>, %84, %cst_28 [1] : vector<8x8xf32> to vector<8xf32>
    %86 = vector.shape_cast %85 : vector<8xf32> to vector<8x1xf32>
    %87 = tpu.reciprocal %86 {approx = true} : vector<8x1xf32> -> vector<8x1xf32>
    %88 = vector.broadcast %87 : vector<8x1xf32> to vector<8x8xf32>
    %89 = arith.mulf %84, %88 : vector<8x8xf32>
    %90 = arith.truncf %89 : vector<8x8xf32> to vector<8x8xbf16>
    %cst_29 = arith.constant dense<0.000000e+00> : vector<8x32xf32>
    %91 = tpu.matmul %90, %76, %cst_29 {dimension_numbers = #tpu.dot_dimension_numbers<[1], [0], [0], [1], [0, 0, 1, 1], [], []>} : vector<8x8xbf16>, vector<8x32xbf16>, vector<8x32xf32> -> vector<8x32xf32>
    %92 = tpu.concatenate %37, %55, %73, %91 in 1 : vector<8x32xf32>, vector<8x32xf32>, vector<8x32xf32>, vector<8x32xf32> -> vector<8x128xf32>
    %93 = arith.truncf %92 : vector<8x128xf32> to vector<8x128xbf16>
    %c0_30 = arith.constant 0 : index
    %c0_31 = arith.constant 0 : index
    %94 = vector.load %arg5[%c0_30, %c0_31] : memref<128x128xbf16, #tpu.memory_space<vmem>>, vector<128x128xbf16>
    %cst_32 = arith.constant dense<0.000000e+00> : vector<8x128xf32>
    %95 = tpu.matmul %93, %94, %cst_32 {dimension_numbers = #tpu.dot_dimension_numbers<[1], [0], [0], [1], [0, 0, 1, 1], [], []>} : vector<8x128xbf16>, vector<128x128xbf16>, vector<8x128xf32> -> vector<8x128xf32>
    %c0_33 = arith.constant 0 : index
    %c0_34 = arith.constant 0 : index
    %96 = vector.load %arg6[%c0_33, %c0_34] : memref<1x128xf32, #tpu.memory_space<vmem>>, vector<1x128xf32>
    %97 = vector.broadcast %96 : vector<1x128xf32> to vector<8x128xf32>
    %98 = arith.addf %95, %97 : vector<8x128xf32>
    %99 = arith.addf %98, %1 : vector<8x128xf32>
    %cst_35 = arith.constant dense<0.000000e+00> : vector<8xf32>
    %100 = vector.multi_reduction <add>, %99, %cst_35 [1] : vector<8x128xf32> to vector<8xf32>
    %101 = vector.shape_cast %100 : vector<8xf32> to vector<8x1xf32>
    %cst_36 = arith.constant 1.280000e+02 : f32
    %102 = vector.broadcast %cst_36 : f32 to vector<8x1xf32>
    %103 = arith.divf %101, %102 : vector<8x1xf32>
    %104 = vector.broadcast %103 : vector<8x1xf32> to vector<8x128xf32>
    %105 = arith.subf %99, %104 : vector<8x128xf32>
    %106 = arith.mulf %105, %105 : vector<8x128xf32>
    %cst_37 = arith.constant dense<0.000000e+00> : vector<8xf32>
    %107 = vector.multi_reduction <add>, %106, %cst_37 [1] : vector<8x128xf32> to vector<8xf32>
    %108 = vector.shape_cast %107 : vector<8xf32> to vector<8x1xf32>
    %cst_38 = arith.constant 1.280000e+02 : f32
    %109 = vector.broadcast %cst_38 : f32 to vector<8x1xf32>
    %110 = arith.divf %108, %109 : vector<8x1xf32>
    %cst_39 = arith.constant 9.99999974E-6 : f32
    %111 = vector.broadcast %cst_39 : f32 to vector<8x1xf32>
    %112 = arith.addf %110, %111 : vector<8x1xf32>
    %113 = math.rsqrt %112 : vector<8x1xf32>
    %114 = vector.broadcast %113 : vector<8x1xf32> to vector<8x128xf32>
    %115 = arith.mulf %105, %114 : vector<8x128xf32>
    %c0_40 = arith.constant 0 : index
    %c0_41 = arith.constant 0 : index
    %116 = vector.load %arg7[%c0_40, %c0_41] : memref<1x128xf32, #tpu.memory_space<vmem>>, vector<1x128xf32>
    %117 = vector.broadcast %116 : vector<1x128xf32> to vector<8x128xf32>
    %118 = arith.mulf %115, %117 : vector<8x128xf32>
    %c0_42 = arith.constant 0 : index
    %c0_43 = arith.constant 0 : index
    %119 = vector.load %arg8[%c0_42, %c0_43] : memref<1x128xf32, #tpu.memory_space<vmem>>, vector<1x128xf32>
    %120 = vector.broadcast %119 : vector<1x128xf32> to vector<8x128xf32>
    %121 = arith.addf %118, %120 : vector<8x128xf32>
    %c0_44 = arith.constant 0 : index
    %c0_45 = arith.constant 0 : index
    %c0_46 = arith.constant 0 : index
    %122 = vector.load %arg9[%c0_44, %c0_45, %c0_46] : memref<1x8x128xf32, #tpu.memory_space<vmem>>, vector<1x8x128xf32>
    %123 = vector.shape_cast %122 : vector<1x8x128xf32> to vector<8x128xf32>
    %124 = vector.shape_cast %121 : vector<8x128xf32> to vector<1x8x128xf32>
    tpu.vector_store %arg9[%c0_44, %c0_45, %c0_46], %124 {strides = array<i32>} : memref<1x8x128xf32, #tpu.memory_space<vmem>>, vector<1x8x128xf32>,
    return
  }
  func.func @transform_0(%arg0: i32) -> (i32, i32, i32) {
    %c0_i32 = arith.constant 0 : i32
    %c0_i32_0 = arith.constant 0 : i32
    %c0_i32_1 = arith.constant 0 : i32
    return %arg0, %c0_i32, %c0_i32_0 : i32, i32, i32
  }
  func.func @transform_1(%arg0: i32) -> (i32, i32, i32) {
    %c0_i32 = arith.constant 0 : i32
    %c0_i32_0 = arith.constant 0 : i32
    %c0_i32_1 = arith.constant 0 : i32
    return %arg0, %c0_i32, %c0_i32_0 : i32, i32, i32
  }
  func.func @transform_2(%arg0: i32) -> (i32, i32) {
    %c0_i32 = arith.constant 0 : i32
    %c0_i32_0 = arith.constant 0 : i32
    %c0_i32_1 = arith.constant 0 : i32
    return %c0_i32, %c0_i32_0 : i32, i32
  }
  func.func @transform_3(%arg0: i32) -> (i32, i32) {
    %c0_i32 = arith.constant 0 : i32
    %c0_i32_0 = arith.constant 0 : i32
    %c0_i32_1 = arith.constant 0 : i32
    return %c0_i32, %c0_i32_0 : i32, i32
  }
  func.func @transform_4(%arg0: i32) -> (i32, i32) {
    %c0_i32 = arith.constant 0 : i32
    %c0_i32_0 = arith.constant 0 : i32
    %c0_i32_1 = arith.constant 0 : i32
    return %c0_i32, %c0_i32_0 : i32, i32
  }
  func.func @transform_5(%arg0: i32) -> (i32, i32) {
    %c0_i32 = arith.constant 0 : i32
    %c0_i32_0 = arith.constant 0 : i32
    %c0_i32_1 = arith.constant 0 : i32
    return %c0_i32, %c0_i32_0 : i32, i32
  }
  func.func @transform_6(%arg0: i32) -> (i32, i32) {
    %c0_i32 = arith.constant 0 : i32
    %c0_i32_0 = arith.constant 0 : i32
    %c0_i32_1 = arith.constant 0 : i32
    return %c0_i32, %c0_i32_0 : i32, i32
  }
  func.func @transform_7(%arg0: i32) -> (i32, i32) {
    %c0_i32 = arith.constant 0 : i32
    %c0_i32_0 = arith.constant 0 : i32
    %c0_i32_1 = arith.constant 0 : i32
    return %c0_i32, %c0_i32_0 : i32, i32
  }
  func.func @transform_8(%arg0: i32) -> (i32, i32, i32) {
    %c0_i32 = arith.constant 0 : i32
    %c0_i32_0 = arith.constant 0 : i32
    %c0_i32_1 = arith.constant 0 : i32
    return %arg0, %c0_i32, %c0_i32_0 : i32, i32, i32
  }
}

</mosaic_0001>

<bundles_post_ra>
// kernel: bert_self_attention.1
= control target key start
LH: loop header
LB: loop body
LE: loop exit
PB: predicated region body
PF: predicated region fallthrough
CT: control target
= control target key end

     0   :  { %13 = vsyncpa [#allocation3], 0  ;;  %s1675_s0 = inlined_call_operand.vmem [shape: f32[2,8,128], index: 0, kind: input, shape index: {}]   ;;  %s1676_s1 = inlined_call_operand.vmem [shape: s32[2,8,8], index: 1, kind: input, shape index: {}]   ;;  %s1677_s2 = inlined_call_operand.vmem [shape: bf16[128,384], index: 2, kind: input, shape index: {}]   ;;  %s1678_s3 = inlined_call_operand.vmem [shape: f32[1,384], index: 3, kind: input, shape index: {}]   ;;  %s1679_s4 = inlined_call_operand.vmem [shape: bf16[128,128], index: 4, kind: input, shape index: {}]   ;;  %s1680_s5 = inlined_call_operand.vmem [shape: f32[1,128], index: 5, kind: input, shape index: {}]   ;;  %s1681_s6 = inlined_call_operand.vmem [shape: f32[1,128], index: 6, kind: input, shape index: {}]   ;;  %s1682_s7 = inlined_call_operand.vmem [shape: f32[1,128], index: 7, kind: input, shape index: {}]   ;;  %s1683_s8 = inlined_call_operand.hbm [shape: f32[2,8,128], index: 8, kind: output, shape index: {}]  }
   0x1   :  { %15 = vsyncpa [#allocation3 + $0x1], 0  ;;  %s1351_s27 = smov 0   ;;  %s1353_s28 = smov 0  }
   0x2   :  { %s1355_s29 = smov 0   ;;  %s1357_s30 = smov 0  }
   0x3 LB: > { %s1372_s9 = sadd.s32 4294967295, %s1300_s30   ;;  %s993_s10 = sadd.s32 4294967294, %s1300_s30   ;;  %s1300_s30 = sphi %s1357_s30, %s1689_s30   ;;  %s1296_s29 = sphi %s1355_s29, %s1688_s29   ;;  %s1292_s28 = sphi %s1353_s28, %s1687_s28   ;;  %s1288_s27 = sphi %s1351_s27, %s1686_s27  }
   0x4   : > { %s1376_s11 = sadd.s32 1, %s1300_s30   ;;  %s206_s12 = sadd.s32 1, %s1296_s29 }
   0x5   : > { %s203_s13 = ssub.s32 %s1300_s30, %s1376_s11  ;;  %p216_p0 = scmp.ne.s32.totalorder %s1296_s29, %s1292_s28 }
   0x6   : > { %p204_p1 = scmp.eq.s32.totalorder %s203_s13, 0  ;;  %p217_p2 = scmp.eq.s32.totalorder %s1372_s9, 1 }
   0x7   : > { %p222_p3 = scmp.ne.s32.totalorder %s1292_s28, %s1288_s27  ;;  %p223_p4 = scmp.eq.s32.totalorder %s993_s10, 1 }
   0x8   : > { %s1387_s14 = scalar_select %p204_p1, %s1296_s29, %s206_s12  }
   0x9   : > { %p1389_p5 = por %p217_p2, %p216_p0  ;;  %p1393_p6 = por %p223_p4, %p222_p3 }
   0xa   : > { %p996_p7 = scmp.ge.s32.totalorder %s1300_s30, 1  ;;  %p273_p8 = scmp.lt.s32.totalorder %s1300_s30, 3 }
   0xc   : > { %p274_p9 = pnand %p996_p7, %p273_p8 }
   0xd   : > { %p310_p10 = scmp.lt.s32.totalorder (!%p274_p9), %s1372_s9, 1  ;;  %s1302_s21 = smov (!%p274_p9), 64  }
   0xe   : > { %277 = sbr.rel (%p274_p9) target bundleno = 1662 (0x67e), region = 52  ;;  %s1303_s22 = smov (!%p274_p9), 96  }
   0xf   : > { %s1304_s23 = smov (!%p274_p9), 32   ;;  %s307_s19 = sand.u32 (!%p274_p9), 1, %s1292_s28  }
  0x10   : > { %s997_s20 = sshll.u32 (!%p274_p9), %s307_s19, 3  ;;  %s907_s18 = scalar_lea.sflag (!%p274_p9), [#allocation3], %s307_s19 }
  0x11   : > { %s309_s13 = scalar_lea.vmem (!%p274_p9), [#allocation2], %s997_s20  ;;  %s1258_s10 = scalar_lea.hbm (!%p274_p9), %s1683_s8, 16 }
  0x13   : > { %v1086_v0 = vld [vmem:[%s1677_s2 + $0xa8] sm:$0xf]  ;;  %v1162_v1 = vld [vmem:[%s1677_s2 + $0xb0] sm:$0xf0]  ;;  %v1161_v2 = vld [vmem:[%s1677_s2 + $0xac] sm:$0xf] }
  0x14   : > { %v1087_v3 = vor.u32 %v1162_v1, %v1086_v0  ;;  %v1088_v4 = vld [vmem:[%s1677_s2 + $0xb4] sm:$0xf0]  ;;  %v1074_v5 = vld [vmem:[%s1677_s2 + $0x90] sm:$0xf]  ;;  %v1159_v6 = vld [vmem:[%s1677_s2 + $0x98] sm:$0xf0] }
  0x15   : > { %v1091_v7 = vor.u32 %v1161_v2, %v1088_v4  ;;  %v1158_v8 = vld [vmem:[%s1677_s2 + $0x94] sm:$0xf]  ;;  %v1076_v9 = vld [vmem:[%s1677_s2 + $0x9c] sm:$0xf0]  ;;  %v1075_v10 = vor.u32 %v1159_v6, %v1074_v5  ;;  %v1062_v12 = vld [vmem:[%s1677_s2 + $0x78] sm:$0xf] }
  0x16   : > { %490 = vmatpush.bf16.msra.mxu0 %v1087_v3  ;;  %v1079_v11 = vor.u32 %v1158_v8, %v1076_v9  ;;  %v1156_v13 = vld [vmem:[%s1677_s2 + $0x80] sm:$0xf0]  ;;  %v1155_v14 = vld [vmem:[%s1677_s2 + $0x7c] sm:$0xf]  ;;  %v1064_v15 = vld [vmem:[%s1677_s2 + $0x84] sm:$0xf0] }
  0x17   : > { %503 = vmatpush.bf16.msra.mxu1 %v1091_v7  ;;  %v1063_v16 = vor.u32 %v1156_v13, %v1062_v12  ;;  %v1067_v17 = vor.u32 %v1155_v14, %v1064_v15  ;;  %v1050_v18 = vld [vmem:[%s1677_s2 + $0x60] sm:$0xf]  ;;  %v1153_v19 = vld [vmem:[%s1677_s2 + $0x68] sm:$0xf0]  ;;  %v1152_v20 = vld [vmem:[%s1677_s2 + $0x64] sm:$0xf] }
  0x18   : > { %v1052_v21 = vld [vmem:[%s1677_s2 + $0x6c] sm:$0xf0]  ;;  %v1051_v22 = vor.u32 %v1153_v19, %v1050_v18  ;;  %v1163_v24 = vld [vmem:[%s1677_s2 + $0xb8] sm:$0xf0]  ;;  %v1082_v25 = vld [vmem:[%s1677_s2 + $0x98] sm:$0xf] }
  0x19   : > { %v1094_v23 = vld [vmem:[%s1677_s2 + $0xb0] sm:$0xf]  ;;  %v1055_v26 = vor.u32 %v1152_v20, %v1052_v21  ;;  %v1038_v27 = vld [vmem:[%s1677_s2 + $0x48] sm:$0xf]  ;;  %v1150_v28 = vld [vmem:[%s1677_s2 + $0x50] sm:$0xf0] }
  0x1a   : > { %491 = vmatpush.bf16.msra.mxu0 %v1075_v10  ;;  %v1095_v29 = vor.u32 %v1163_v24, %v1094_v23  ;;  %v1160_v30 = vld [vmem:[%s1677_s2 + $0xa0] sm:$0xf0]  ;;  %v1149_v31 = vld [vmem:[%s1677_s2 + $0x4c] sm:$0xf]  ;;  %v1040_v32 = vld [vmem:[%s1677_s2 + $0x54] sm:$0xf0]  ;;  %v1039_v34 = vor.u32 %v1150_v28, %v1038_v27 }
  0x1b   : > { %504 = vmatpush.bf16.msra.mxu1 %v1079_v11  ;;  %v1083_v33 = vor.u32 %v1160_v30, %v1082_v25  ;;  %v1070_v35 = vld [vmem:[%s1677_s2 + $0x80] sm:$0xf]  ;;  %v1157_v36 = vld [vmem:[%s1677_s2 + $0x88] sm:$0xf0]  ;;  %v1043_v37 = vor.u32 %v1149_v31, %v1040_v32  ;;  %v1026_v38 = vld [vmem:[%s1677_s2 + $0x30] sm:$0xf] }
  0x1c   : > { %516 = vmatpush.bf16.msra.mxu2 %v1095_v29  ;;  %v1147_v39 = vld [vmem:[%s1677_s2 + $0x38] sm:$0xf0]  ;;  %v1146_v40 = vld [vmem:[%s1677_s2 + $0x34] sm:$0xf]  ;;  %v1028_v41 = vld [vmem:[%s1677_s2 + $0x3c] sm:$0xf0]  ;;  %v1071_v42 = vor.u32 %v1157_v36, %v1070_v35 }
  0x1d   : > { %s1491_s25 = scalar_select %p310_p10, %s1372_s9, 1  ;;  %v1027_v43 = vor.u32 %v1147_v39, %v1026_v38  ;;  %v1058_v44 = vld [vmem:[%s1677_s2 + $0x68] sm:$0xf]  ;;  %v1154_v45 = vld [vmem:[%s1677_s2 + $0x70] sm:$0xf0]  ;;  %v1031_v46 = vor.u32 %v1146_v40, %v1028_v41  ;;  %vm534_vm0 = vcmask 261120  }
  0x1e   : > { %492 = vmatpush.bf16.msra.mxu0 %v1063_v16  ;;  %v1014_v47 = vld [vmem:[%s1677_s2 + $0x18] sm:$0xf]  ;;  %v1144_v48 = vld [vmem:[%s1677_s2 + $0x20] sm:$0xf0]  ;;  %v1143_v49 = vld [vmem:[%s1677_s2 + $0x1c] sm:$0xf]  ;;  %v1059_v51 = vor.u32 %v1154_v45, %v1058_v44 }
  0x1f   : > { %505 = vmatpush.bf16.msra.mxu1 %v1067_v17  ;;  %v1016_v50 = vld [vmem:[%s1677_s2 + $0x24] sm:$0xf0]  ;;  %s998_s26 = sshll.u32 %s1491_s25, 3  ;;  %v1015_v52 = vor.u32 %v1144_v48, %v1014_v47  ;;  %v1046_v53 = vld [vmem:[%s1677_s2 + $0x50] sm:$0xf]  ;;  %vm571_vm1 = vcmask 1043456  }
  0x20   : > { %517 = vmatpush.bf16.msra.mxu2 %v1083_v33  ;;  %v1151_v54 = vld [vmem:[%s1677_s2 + $0x58] sm:$0xf0]  ;;  %v1019_v55 = vor.u32 %v1143_v49, %v1016_v50  ;;  %v1002_v56 = vld [vmem:[%s1677_s2] sm:$0xf]  ;;  %v1141_v57 = vld [vmem:[%s1677_s2 + $0x8] sm:$0xf0]  ;;  %s313_s24 = scalar_lea.vmem %s1675_s0, %s998_s26  ;;  %s317_s12 = scalar_lea.vmem %s1676_s1, %s998_s26 }
  0x21   : > { %v1140_v58 = vld [vmem:[%s1677_s2 + $0x4] sm:$0xf]  ;;  %v1004_v59 = vld [vmem:[%s1677_s2 + $0xc] sm:$0xf0]  ;;  %v1047_v60 = vor.u32 %v1151_v54, %v1046_v53  ;;  %v1003_v61 = vor.u32 %v1141_v57, %v1002_v56  ;;  %v1034_v63 = vld [vmem:[%s1677_s2 + $0x38] sm:$0xf] }
  0x22   : > { %493 = vmatpush.bf16.msra.mxu0 %v1051_v22  ;;  %v1535_v62 = vld [vmem:[%s313_s24] sm:$0xff]  ;;  %v1007_v1 = vor.u32 %v1140_v58, %v1004_v59  ;;  %v1145_v5 = vld [vmem:[%s1677_s2 + $0x28] sm:$0xf0]  ;;  %v1010_v7 = vld [vmem:[%s1677_s2 + $0x8] sm:$0xf]  ;;  %vm555_vm3 = vcmask 64512  }
  0x23   : > { %506 = vmatpush.bf16.msra.mxu1 %v1055_v26  ;;  %v1148_v0 = vld [vmem:[%s1677_s2 + $0x40] sm:$0xf0]  ;;  %v321_v2 = vpack.c.bf16 %v1535_v62, %v1535_v62  ;;  %v1022_v4 = vld [vmem:[%s1677_s2 + $0x20] sm:$0xf]  ;;  %v1142_v8 = vld [vmem:[%s1677_s2 + $0x10] sm:$0xf0] }
  0x24   : > { %518 = vmatpush.bf16.msra.mxu2 %v1071_v42  ;;  %v1035_v3 = vor.u32 %v1148_v0, %v1034_v63  ;;  %v1023_v6 = vor.u32 %v1145_v5, %v1022_v4  ;;  %v1011_v9 = vor.u32 %v1142_v8, %v1010_v7  ;;  %v354_v10 = vld [vmem:[%s1678_s3] sm:$0x7]  ;;  %vm781_vm4 = vcmask 523264  }
  0x25   : > { %v356_v11 = vperm.slane %v354_v10, 0  ;;  %v357_v12 = vperm.slane %v354_v10, 1  ;;  %v358_v28 = vperm.slane %v354_v10, 2  ;;  %vm783_vm5 = vcmask 785408  }
  0x26   : > { %494 = vmatpush.bf16.msra.mxu0 %v1039_v34 }
  0x27   : > { %507 = vmatpush.bf16.msra.mxu1 %v1043_v37  ;;  %v320_v37 = vld [vmem:[%s317_s12] sm:$0xff] }
  0x28   : > { %519 = vmatpush.bf16.msra.mxu2 %v1059_v51  ;;  %vm533_vm2 = vcmp.ne.s32.totalorder %v320_v37, 0 }
  0x2a   : > { %495 = vmatpush.bf16.msra.mxu0 %v1027_v43 }
  0x2b   : > { %508 = vmatpush.bf16.msra.mxu1 %v1031_v46 }
  0x2c   : > { %520 = vmatpush.bf16.msra.mxu2 %v1047_v60 }
  0x2e   : > { %496 = vmatpush.bf16.msra.mxu0 %v1015_v52 }
  0x2f   : > { %509 = vmatpush.bf16.msra.mxu1 %v1019_v55 }
  0x30   : > { %521 = vmatpush.bf16.msra.mxu2 %v1035_v3 }
  0x32   : > { %497 = vmatpush.bf16.msra.mxu0 %v1003_v61 }
  0x33   : > { %510 = vmatpush.bf16.msra.mxu1 %v1007_v1 }
  0x34   : > { %522 = vmatpush.bf16.msra.mxu2 %v1023_v6 }
  0x35   : > { %498 = vmatmul.bf16.vlgmr.msra.gmra.mxu0 %v321_v2 }
  0x36   : > { %511 = vmatmul.bf16.vlgmr.msra.gmra.mxu1 %v321_v2 }
  0x38   : > { %523 = vmatpush.bf16.msra.mxu2 %v1011_v9 }
  0x3b   : > { %524 = vmatmul.bf16.vlgmr.msra.gmra.mxu2 %v321_v2 }
  0xb2   : > { %v499_v13 = vpop.f32.mrf.mxu0 }
  0xb3   : > { %v500_v14 = vadd.f32 %v499_v13, %v356_v11  ;;  %v512_v15 = vpop.f32.mrf.mxu1 }
  0xb4   : > { %v513_v16 = vadd.f32 %v512_v15, %v357_v12 }
  0xb5   : > { %v529_v17 = vmul.f32 0.17677669, %v500_v14 }
  0xb6   : > { %v531_v18 = vpack.c.bf16 %v513_v16, %v513_v16 }
  0xb7   : > { %v530_v19 = vpack.c.bf16 %v529_v17, %v529_v17 }
  0xb8   : > { %v594_v20 = vunpack.c.l.b16 %v531_v18  ;;  %v539_v21 = vsel %vm534_vm0, %v531_v18, 0 }
  0xb9   : > { %548 = vmatpush.bf16.xpose.msra.mxu3 %v539_v21  ;;  %v589_v25 = vunpack.c.l.b16 %v530_v19 }
  0xba   : > { %v595_v22 = vpack.c.b16 %v594_v20, %v594_v20  ;;  %v501_v23 = vpop.f32.mrf.mxu0 }
  0xbb   : > { %v514_v24 = vpop.f32.mrf.mxu1  ;;  %v590_v26 = vpack.c.b16 %v589_v25, %v589_v25 }
  0xbc   : > { %656 = vrot.lane.b32.xlu2 %v595_v22, %s1302_s21  ;;  %596 = vrot.lane.b32.xlu1 %v595_v22, %s1303_s22 }
  0xbe   : > { %v525_v27 = vpop.f32.mrf.mxu2 }
  0xbf   : > { %v526_v29 = vadd.f32 %v525_v27, %v358_v28 }
  0xc0   : > { %1096 = vmatmul.msk.bf16.vlgmr.msra.gmra.mxu3 %vm534_vm0, %v530_v19 }
  0xc1   : > { %v532_v31 = vpack.c.bf16 %v526_v29, %v526_v29 }
  0xc3   : > { %v573_v32 = vsel %vm571_vm1, %v532_v31, 0  ;;  %v631_v7 = vunpack.c.l.b16 %v532_v31 }
  0xc4   : > { %713 = vrot.lane.b32.xlu2 %v595_v22, %s1304_s23  ;;  %591 = vrot.lane.b32.xlu1 %v590_v26, %s1303_s22 }
  0xc5   : > { %582 = vmatpush.bf16.msrb.mxu3 %v573_v32  ;;  %v632_v8 = vpack.c.b16 %v631_v7, %v631_v7 }
  0xc6   : > { %v527_v30 = vpop.f32.mrf.mxu2 }
  0xcc   : > { %711 = vrot.lane.b32.xlu1 %v590_v26, %s1304_s23 }
 0x116   : > { %v657_v33 = vpop.permute.xlu2 %656 }
 0x117   : > { %v662_v34 = vsel %vm534_vm0, %v657_v33, 0 }
 0x118   : > { %671 = vmatpush.bf16.xpose.msrb.mxu2 %v662_v34 }
 0x11e   : > { %v714_v50 = vpop.permute.xlu2 %713 }
 0x11f   : > { %v719_v52 = vsel %vm534_vm0, %v714_v50, 0  ;;  %v1169_v50 = vld [vmem:[%s1679_s4 + $0x28] sm:$0xff] }
 0x12e   : > { %v597_v35 = vpop.permute.xlu1 %596 }
 0x12f   : > { %v602_v36 = vsel %vm534_vm0, %v597_v35, 0 }
 0x130   : > { %611 = vmatpush.bf16.xpose.msra.mxu3 %v602_v36 }
 0x136   : > { %v592_v54 = vpop.permute.xlu1 %591 }
 0x13e   : > { %v712_v55 = vpop.permute.xlu1 %711 }
 0x143   : > { %v550_v38 = vpop.f32.mrf.mxu3 }
 0x144   : > { %v554_v39 = vsel %vm533_vm2, -1e+09, %v550_v38 }
 0x145   : > { %v556_v40 = vsel %vm555_vm3, %v554_v39, -inf }
 0x146   : > { %557 = vmax.xlane.f32.xlu0 %v556_v40 }
 0x14b   : > { %v552_v41 = vpop.f32.mrf.mxu3 }
 0x1b9   : > { %v558_v42 = vpop.xlane.xlu0 %557 }
 0x1ba   : > { %v559_v43 = vsub.f32 %v554_v39, %v558_v42 }
 0x1bc   : > { %v560_v44 = vmul.f32 1.442695, %v559_v43 }
 0x1be   : > { %1218 = vpow2.f32 %v560_v44 }
 0x1c4   : > { %v1219_v45 = vpop.eup %1218 }
 0x1c5   : > { %v562_v46 = vsel %vm555_vm3, %v1219_v45, 0.0 }
 0x1c6   : > { %563 = vadd.xlane.f32.xlu0 %v562_v46 }
 0x1da   : > { %654 = vrot.lane.b32.xlu0 %v590_v26, %s1302_s21 }
 0x239   : > { %v564_v47 = vpop.xlane.xlu0 %563 }
 0x23a   : > { %1220 = vrcp.f32 %v564_v47 }
 0x240   : > { %v1221_v48 = vpop.eup %1220 }
 0x241   : > { %v566_v49 = vmul.f32 %v1221_v48, %v1219_v45  ;;  %v1171_v48 = vld [vmem:[%s1679_s4 + $0x38] sm:$0xff] }
 0x242   : > { %854 = vmatpush.bf16.msrb.mxu1 %v1171_v48 }
 0x243   : > { %v567_v51 = vpack.c.bf16 %v566_v49, %v566_v49  ;;  %v1170_v49 = vld [vmem:[%s1679_s4 + $0x30] sm:$0xff] }
 0x245   : > { %1097 = vmatmul.msk.bf16.vlgmr.msrb.gmra.mxu3 %vm555_vm3, %v567_v51  ;;  %v1168_v51 = vld [vmem:[%s1679_s4 + $0x20] sm:$0xff] }
 0x246   : > { %728 = vmatpush.bf16.xpose.msrb.mxu3 %v719_v52  ;;  %855 = vmatpush.bf16.msrb.mxu1 %v1170_v49  ;;  %v1167_v52 = vld [vmem:[%s1679_s4 + $0x18] sm:$0xff] }
 0x24a   : > { %856 = vmatpush.bf16.msrb.mxu1 %v1169_v50 }
 0x24c   : > { %v655_v53 = vpop.permute.xlu0 %654 }
 0x24d   : > { %1100 = vmatmul.msk.bf16.vlgmr.msrb.gmra.mxu2 %vm534_vm0, %v655_v53  ;;  %v1166_v53 = vld [vmem:[%s1679_s4 + $0x10] sm:$0xff] }
 0x24e   : > { %857 = vmatpush.bf16.msrb.mxu1 %v1168_v51 }
 0x252   : > { %858 = vmatpush.bf16.msrb.mxu1 %v1167_v52 }
 0x255   : > { %1098 = vmatmul.msk.bf16.vlgmr.msra.gmra.mxu3 %vm534_vm0, %v592_v54  ;;  %v1165_v54 = vld [vmem:[%s1679_s4 + $0x8] sm:$0xff] }
 0x256   : > { %859 = vmatpush.bf16.msrb.mxu1 %v1166_v53 }
 0x25a   : > { %860 = vmatpush.bf16.msrb.mxu1 %v1165_v54 }
 0x265   : > { %1102 = vmatmul.msk.bf16.vlgmr.msrb.gmra.mxu3 %vm534_vm0, %v712_v55  ;;  %v1164_v55 = vld [vmem:[%s1679_s4] sm:$0xff] }
 0x266   : > { %861 = vmatpush.bf16.msrb.mxu1 %v1164_v55 }
 0x2c8   : > { %v1584_v56 = vpop.f32.mrf.mxu3 }
 0x2d0   : > { %v586_v57 = vpop.f32.mrf.mxu3  ;;  %v673_v58 = vpop.f32.mrf.mxu2 }
 0x2d1   : > { %v677_v59 = vsel %vm533_vm2, -1e+09, %v673_v58 }
 0x2d2   : > { %v678_v60 = vsel %vm555_vm3, %v677_v59, -inf }
 0x2d3   : > { %679 = vmax.xlane.f32.xlu1 %v678_v60 }
 0x2d8   : > { %v613_v61 = vpop.f32.mrf.mxu3  ;;  %v675_v63 = vpop.f32.mrf.mxu2 }
 0x2d9   : > { %v617_v0 = vsel %vm533_vm2, -1e+09, %v613_v61 }
 0x2da   : > { %v618_v1 = vsel %vm555_vm3, %v617_v0, -inf }
 0x2db   : > { %619 = vmax.xlane.f32.xlu2 %v618_v1  ;;  %v1215_v1 = vld [vmem:[%s1680_s5] ss:$0 sm:$0xff] }
 0x2e0   : > { %v615_v2 = vpop.f32.mrf.mxu3 }
 0x2e8   : > { %v730_v3 = vpop.f32.mrf.mxu3 }
 0x2e9   : > { %v734_v4 = vsel %vm533_vm2, -1e+09, %v730_v3 }
 0x2ea   : > { %v735_v5 = vsel %vm555_vm3, %v734_v4, -inf }
 0x2eb   : > { %736 = vmax.xlane.f32.xlu0 %v735_v5 }
 0x2f0   : > { %v732_v6 = vpop.f32.mrf.mxu3 }
 0x2f1   : > { %v1305_v6 = vmov 128.0  }
 0x2ff   : > { %690 = vrot.lane.b32.xlu0 %v632_v8, %s1302_s21 }
 0x346   : > { %v680_v9 = vpop.xlane.xlu1 %679 }
 0x347   : > { %v681_v10 = vsub.f32 %v677_v59, %v680_v9 }
 0x349   : > { %v682_v11 = vmul.f32 1.442695, %v681_v10 }
 0x34b   : > { %1222 = vpow2.f32 %v682_v11 }
 0x34e   : > { %v620_v12 = vpop.xlane.xlu2 %619 }
 0x34f   : > { %v621_v13 = vsub.f32 %v617_v0, %v620_v12 }
 0x351   : > { %v1223_v14 = vpop.eup %1222  ;;  %v622_v15 = vmul.f32 1.442695, %v621_v13 }
 0x352   : > { %v684_v16 = vsel %vm555_vm3, %v1223_v14, 0.0 }
 0x353   : > { %1224 = vpow2.f32 %v622_v15  ;;  %685 = vadd.xlane.f32.xlu1 %v684_v16 }
 0x359   : > { %v1225_v17 = vpop.eup %1224 }
 0x35a   : > { %v624_v18 = vsel %vm555_vm3, %v1225_v17, 0.0 }
 0x35b   : > { %625 = vadd.xlane.f32.xlu2 %v624_v18 }
 0x35e   : > { %v737_v19 = vpop.xlane.xlu0 %736 }
 0x35f   : > { %v738_v20 = vsub.f32 %v734_v4, %v737_v19 }
 0x361   : > { %v739_v21 = vmul.f32 1.442695, %v738_v20 }
 0x363   : > { %1226 = vpow2.f32 %v739_v21 }
 0x369   : > { %v1227_v22 = vpop.eup %1226 }
 0x36a   : > { %v741_v23 = vsel %vm555_vm3, %v1227_v22, 0.0 }
 0x36b   : > { %742 = vadd.xlane.f32.xlu1 %v741_v23 }
 0x371   : > { %v691_v24 = vpop.permute.xlu0 %690 }
 0x372   : > { %v696_v25 = vsel %vm571_vm1, %v691_v24, 0  ;;  %v1216_v24 = vld [vmem:[%s1681_s6] ss:$0 sm:$0xff] }
 0x373   : > { %633 = vrot.lane.b32.xlu2 %v632_v8, %s1303_s22  ;;  %705 = vmatpush.bf16.msra.mxu2 %v696_v25 }
 0x384   : > { %747 = vrot.lane.b32.xlu1 %v632_v8, %s1304_s23 }
 0x3c6   : > { %v686_v26 = vpop.xlane.xlu1 %685 }
 0x3c7   : > { %1228 = vrcp.f32 %v686_v26 }
 0x3cd   : > { %v1229_v27 = vpop.eup %1228 }
 0x3ce   : > { %v688_v28 = vmul.f32 %v1229_v27, %v1223_v14  ;;  %v626_v29 = vpop.xlane.xlu2 %625  ;;  %v1217_v27 = vld [vmem:[%s1682_s7] ss:$0 sm:$0xff] }
 0x3cf   : > { %1230 = vrcp.f32 %v626_v29 }
 0x3d0   : > { %v689_v30 = vpack.c.bf16 %v688_v28, %v688_v28 }
 0x3d2   : > { %1101 = vmatmul.msk.bf16.vlgmr.msra.gmra.mxu2 %vm555_vm3, %v689_v30 }
 0x3d5   : > { %v1231_v31 = vpop.eup %1230 }
 0x3d6   : > { %v628_v32 = vmul.f32 %v1231_v31, %v1225_v17  ;;  %v634_v33 = vpop.permute.xlu2 %633 }
 0x3d7   : > { %v639_v34 = vsel %vm571_vm1, %v634_v33, 0 }
 0x3d8   : > { %648 = vmatpush.bf16.msrb.mxu0 %v639_v34  ;;  %v629_v35 = vpack.c.bf16 %v628_v32, %v628_v32 }
 0x3db   : > { %1099 = vmatmul.msk.bf16.vlgmr.msrb.gmra.mxu0 %vm555_vm3, %v629_v35 }
 0x3de   : > { %v743_v36 = vpop.xlane.xlu1 %742 }
 0x3df   : > { %1232 = vrcp.f32 %v743_v36 }
 0x3e0   : > { %1234 = vrcp.f32 %v1305_v6 }
 0x3e5   : > { %v1233_v37 = vpop.eup %1232 }
 0x3e6   : > { %v745_v38 = vmul.f32 %v1233_v37, %v1227_v22  ;;  %v1235_v7 = vpop.eup %1234 }
 0x3e7   : > { %v871_v8 = vmul.f32 128.0, %v1235_v7  ;;  %vm875_vm6 = vweird.f32 %v1235_v7 }
 0x3e8   : > { %v746_v41 = vpack.c.bf16 %v745_v38, %v745_v38 }
 0x3f6   : > { %v748_v39 = vpop.permute.xlu1 %747 }
 0x3f7   : > { %v753_v40 = vsel %vm571_vm1, %v748_v39, 0 }
 0x3f8   : > { %762 = vmatpush.bf16.msra.mxu0 %v753_v40 }
 0x3fb   : > { %1103 = vmatmul.msk.bf16.vlgmr.msra.gmra.mxu0 %vm555_vm3, %v746_v41 }
 0x455   : > { %v707_v42 = vpop.f32.mrf.mxu2 }
 0x458   : > { %v650_v43 = vpop.f32.mrf.mxu0 }
 0x459   : > { %769 = vrot.lane.b32.xlu2 %v650_v43, %s1304_s23 }
 0x45d   : > { %v709_v44 = vpop.f32.mrf.mxu2 }
 0x460   : > { %v652_v45 = vpop.f32.mrf.mxu0 }
 0x461   : > { %773 = vrot.lane.b32.xlu2 %v707_v42, %s1302_s21  ;;  %s1137_s21 = sshll.u32 %s1372_s9, 3  ;;  %s919_s9 = sshll.u32 %s309_s13, 4  ;;  %s920_s9 = int_to_ptr.vmem [resolvable:$true] %s919_s9 }
 0x462   : > { %s917_s12 = scalar_lea.hbm %s1683_s8, %s1137_s21 }
 0x463   : > { %s921_s17 = sshll.u32 %s917_s12, 4  ;;  %s922_s17 = int_to_ptr.hbm [resolvable:$true] %s921_s17 }
 0x478   : > { %v764_v46 = vpop.f32.mrf.mxu0 }
 0x479   : > { %777 = vrot.lane.b32.xlu0 %v764_v46, %s1303_s22  ;;  %s1252_s22 = sshra.s32 %s922_s17, 4  ;;  %s1253_s22 = int_to_ptr.hbm [resolvable:$true] %s1252_s22 }
 0x47a   : > { %s1254_s23 = scalar_lea.hbm %s1253_s22, 8  ;;  %p1259_p0 = scmp.lt.s32.totalorder %s1253_s22, %s1683_s8 }
 0x47b   : > { %p1255_p11 = scmp.ne.s32.totalorder %s1253_s22, %s1254_s23  ;;  %p1260_p1 = scmp.lt.s32.totalorder %s1258_s10, %s1254_s23 }
 0x47d   : > { %p1256_p12 = pnand %p1255_p11, %p1389_p5  ;;  %p1261_p2 = por %p1260_p1, %p1259_p0 }
 0x47f   : > { %p1257_p13 = pneg %p1256_p12 }
 0x480   : > { %v766_v47 = vpop.f32.mrf.mxu0 }
 0x481   : > { %p1262_p3 = pnand %p1261_p2, %p1257_p13 }
 0x4b3   : > { %v770_v57 = vpop.permute.xlu2 %769 }
 0x4b4   : > { %v780_v59 = vsel %vm534_vm0, %v1584_v56, %v770_v57  ;;  %v872_v56 = vsub.f32 1.0, %v871_v8 }
 0x4b6   : > { %v873_v9 = vmul.f32 %v1235_v7, %v872_v56 }
 0x4b8   : > { %v874_v10 = vadd.f32 %v1235_v7, %v873_v9 }
 0x4ba   : > { %v876_v11 = vsel %vm875_vm6, %v1235_v7, %v874_v10 }
 0x4bb   : > { %v774_v58 = vpop.permute.xlu2 %773 }
 0x4bc   : > { %v782_v60 = vsel %vm781_vm4, %v780_v59, %v774_v58 }
 0x4eb   : > { %v778_v61 = vpop.permute.xlu0 %777 }
 0x4ec   : > { %v784_v63 = vsel %vm783_vm5, %v782_v60, %v778_v61 }
 0x4ed   : > { %v785_v0 = vpack.c.bf16 %v784_v63, %v784_v63 }
 0x4ef   : > { %862 = vmatmul.bf16.vlgmr.msrb.gmra.mxu1 %v785_v0 }
 0x56c   : > { %v863_v2 = vpop.f32.mrf.mxu1 }
 0x56d   : > { %v864_v3 = vadd.f32 %v1215_v1, %v863_v2 }
 0x56f   : > { %v867_v4 = vadd.f32 %v864_v3, %v1535_v62 }
 0x571   : > { %868 = vadd.xlane.f32.xlu2 %v867_v4 }
 0x574   : > { %v865_v5 = vpop.f32.mrf.mxu1 }
 0x5e4   : > { %v869_v12 = vpop.xlane.xlu2 %868 }
 0x5e5   : > { %v877_v13 = vmul.f32 %v876_v11, %v869_v12 }
 0x5e7   : > { %v878_v14 = vsub.f32 %v867_v4, %v877_v13 }
 0x5e9   : > { %v879_v15 = vmul.f32 %v878_v14, %v878_v14 }
 0x5eb   : > { %880 = vadd.xlane.f32.xlu0 %v879_v15 }
 0x65e   : > { %v881_v16 = vpop.xlane.xlu0 %880 }
 0x65f   : > { %v882_v62 = vmul.f32 %v881_v16, %v876_v11 }
 0x661   : > { %v883_v17 = vadd.f32 1e-05, %v882_v62 }
 0x663   : > { %1236 = vrsqrt.f32 %v883_v17  ;;  %vm890_vm8 = vweird.f32 %v883_v17 }
 0x669   : > { %v1237_v18 = vpop.eup %1236 }
 0x66a   : > { %v885_v19 = vmul.f32 %v1237_v18, %v883_v17  ;;  %vm891_vm7 = vweird.f32 %v1237_v18 }
 0x66b   : > { %vm892_vm9 = vmor %vm890_vm8, %vm891_vm7 }
 0x66c   : > { %v886_v20 = vmul.f32 %v1237_v18, %v885_v19 }
 0x66e   : > { %v887_v21 = vmul.f32 0.5, %v886_v20 }
 0x670   : > { %v888_v22 = vsub.f32 1.5, %v887_v21 }
 0x672   : > { %v889_v23 = vmul.f32 %v1237_v18, %v888_v22 }
 0x674   : > { %v893_v25 = vsel %vm892_vm9, %v1237_v18, %v889_v23 }
 0x675   : > { %v894_v26 = vmul.f32 %v893_v25, %v878_v14 }
 0x677   : > { %v899_v28 = vmul.f32 %v1216_v24, %v894_v26 }
 0x679   : > { %v904_v29 = vadd.f32 %v1217_v27, %v899_v28 }
 0x67b   : > { %905 = vst [vmem:[%s309_s13] sm:$0xff] %v904_v29 }
 0x67c   : > { %1265 = shalt.err (!%p1262_p3)
}
 0x67d   : > { %1172 = dma.vmem_to_hbm [thread:$0]  (%p1389_p5), %s920_s9, 128, %s922_s17, %s907_s18  }
 0x67e PF: > { %p1178_p4 = scmp.ge.s32.totalorder %s1300_s30, 2  ;;  %s933_s19 = sand.u32 1, %s1288_s27  }
 0x67f   : > { %s934_s12 = scalar_lea.sflag [#allocation3], %s933_s19 }
 0x680   : > { %p1175_p7 = pnand %p1178_p4, %p1393_p6 }
 0x682   : > { %p1176_p8 = pneg %p1175_p7 }
 0x684   : > { %1283 = dma.done.wait (%p1176_p8), %s934_s12, 128  }
 0x685   : > { %1285 = vsyncadd (%p1176_p8), %s934_s12, 4294967168  ;;  %p18_p9 = scmp.ge.s32.totalorder %s1376_s11, 4   ;;  %s1686_s27 = smov %s1292_s28 }
 0x686   : > { %s1687_s28 = smov %s1296_s29  ;;  %s1688_s29 = smov %s1387_s14 }
 0x687   : > { %s1689_s30 = smov %s1376_s11  ;;  %20 = sbr.rel (!%p18_p9) target bundleno = 3 (0x3), region = 90 }
 0x68c   :  { %940 = vsyncpa [#allocation3], 1 }
 0x68d   :  { %942 = vsyncpa [#allocation3 + $0x1], 1 }

</bundles_post_ra>
